<compile_context>
chip_gen: v5e
topology: v5e:2x2
jax: 0.10.0
libtpu: 0.0.40
codegen_flags: <defaults>
</compile_context>

<pallas_src>
import numpy as np
import jax
import jax.numpy as jnp
from jax import lax
from jax.experimental import pallas as pl
from jax.experimental.pallas import tpu as pltpu


# ------------------------------ kernel ---------------------------------------


def _som_bmu_kernel(w_ref, wsq_ref, x_ref, idx_ref):
    """BMU (closest codebook row) index for every data point in this N-tile.

    w_ref:   (T, D)  f32   full codebook (block index constant across the grid)
    wsq_ref: (T, 1)  f32   0.5 * ||w_k||^2 (precomputed once in the wrapper)
    x_ref:   (TN, D) f32   data tile
    idx_ref: (1, TN) i32   BMU index per data point in this tile
    """
    w = w_ref[...]                                             # (T, D)
    x = x_ref[...]                                             # (TN, D)

    # Contract over D of BOTH operands (q @ k.T pattern): no materialized x.T,
    # no XLU pass over the large operand; MXU accumulates in f32.
    cross = lax.dot_general(
        w, x,
        dimension_numbers=(((1,), (1,)), ((), ())),
        preferred_element_type=jnp.float32,
    )                                                          # (T, TN)

    # NOTE: `scores` is NOT a distance matrix (||x||^2 dropped) — only its
    # argmin over k is meaningful, which is all downstream code needs.
    scores = wsq_ref[...] - cross                              # (T, TN)

    # argmin over the codebook axis; first-occurrence tie-break like np.argmin.
    idx = jnp.argmin(scores, axis=0).astype(jnp.int32)         # (TN,)
    idx_ref[...] = idx[None, :]                                # (1, TN)


# ------------------------------ wrapper --------------------------------------


_TN_MAX = 16384          # max rows per N-tile (~16 MiB of double-buffered VMEM)
_MIN_SPLIT_ROWS = 2048   # don't shrink tiles below this just to feed 2 cores


def _round_up(x, m):
    return ((x + m - 1) // m) * m


def _choose_tiling(n):
    """Pick (tile_n, padded_n): big tiles first, then pad N up to a multiple."""
    n128 = _round_up(max(n, 1), 128)
    if n128 <= 2 * _MIN_SPLIT_ROWS:
        tiles = 1
    else:
        # >=2 tiles so both v7x TensorCores get work; enough tiles that each
        # stays <= _TN_MAX (keeps double-buffered VMEM inside the 48 MiB limit).
        tiles = max(2, -(-n128 // _TN_MAX))
    tn = _round_up(-(-n128 // tiles), 128)
    return tn, tn * tiles


def _som_bmu_indices_impl(weights, data):
    """weights: (T, D) f32, data: (N, D) f32 -> (N,) int32 BMU indices."""
    T, D = weights.shape
    N, D2 = data.shape
    assert D == D2

    weights = weights.astype(jnp.float32)
    data = data.astype(jnp.float32)

    # Pick the tile size first, then pad N up to a multiple of it (padded rows
    # produce valid-but-unused argmins that are sliced off below).
    tn, n_pad = _choose_tiling(N)
    if n_pad != N:
        data = jnp.pad(data, ((0, n_pad - N), (0, 0)))

    # Hoist 0.5*||w_k||^2 out of the per-N-tile work (constant across the grid).
    half_w_sq = 0.5 * jnp.sum(weights * weights, axis=1, keepdims=True)  # (T, 1)

    grid = (n_pad // tn,)
    out = pl.pallas_call(
        _som_bmu_kernel,
        out_shape=jax.ShapeDtypeStruct((1, n_pad), jnp.int32),
        grid_spec=pl.GridSpec(
            grid=grid,
            in_specs=[
                pl.BlockSpec((T, D), lambda j: (0, 0)),   # codebook, resident
                pl.BlockSpec((T, 1), lambda j: (0, 0)),   # 0.5*||w||^2, resident
                pl.BlockSpec((tn, D), lambda j: (j, 0)),  # data tile, streamed
            ],
            out_specs=pl.BlockSpec((1, tn), lambda j: (0, j)),
        ),
        compiler_params=pltpu.CompilerParams(
            # N-tiles are independent -> shard across both TCs on v7x.
            dimension_semantics=("parallel",),
            # (TN,32) f32 tiles lane-pad to 128 in VMEM -> TN*512 B per buffer,
            # x2 double-buffered; 48 MiB covers TN=16384 on v5e/v6e/v7x.
            vmem_limit_bytes=48 << 20,
        ),
        cost_estimate=pl.CostEstimate(
            flops=2 * T * n_pad * D,
            bytes_accessed=(T * D + n_pad * D) * 4 + n_pad * 4,
            transcendentals=0,
        ),
    )(weights, half_w_sq, data)
    return out[0, :N]


som_bmu_indices = jax.jit(_som_bmu_indices_impl)


def som_forward(weights, data):
    """Full SOM.forward: weights of the unique BMUs (+ BMU indices for checking).

    The np.unique produces a data-dependent output length, so (exactly like the
    original PyTorch module, which runs the whole forward in numpy) it is
    host-side glue.
    """
    closest = jax.block_until_ready(som_bmu_indices(weights, data))
    closest_np = np.asarray(closest)
    # TODO(synk): unique + variable-length gather is dynamic-shape; kept on host as in the original module.
    unique_node_indices = np.unique(closest_np)               # sorted unique
    final_weights = np.asarray(weights)[unique_node_indices]
    return final_weights, closest_np


# ------------------------------ self-test ------------------------------------


def _reference_dists(weights_np, data_np):
    return np.linalg.norm(weights_np[:, None, :] - data_np[None, :, :], axis=2)


if __name__ == "__main__":
    # SOM(dim_1=4, dim_2=4, input_dim=32) -> t_dim = 16 codebook vectors.
    dim_1, dim_2, input_dim = 4, 4, 32
    t_dim = dim_1 * dim_2
    N = 8  # number of data points

    key = jax.random.PRNGKey(0)
    kw, kx = jax.random.split(key)
    weights = jax.random.normal(kw, (t_dim, input_dim), dtype=jnp.float32)
    data = jax.random.normal(kx, (N, input_dim), dtype=jnp.float32)

    final_weights, closest = som_forward(weights, data)

    # Cross-check against a plain numpy reference of the PyTorch forward.
    w_np = np.asarray(weights)
    x_np = np.asarray(data)
    dists = _reference_dists(w_np, x_np)
    ref_closest = np.argmin(dists, axis=0)

    mismatch = closest != ref_closest
    if mismatch.any():
        # The argmin surrogate can flip only on numerical near-ties; verify that
        # any disagreement is indeed a tie within tolerance.
        cols = np.where(mismatch)[0]
        d_kernel = dists[closest[cols], cols]
        d_ref = dists[ref_closest[cols], cols]
        assert np.allclose(d_kernel, d_ref, rtol=1e-5, atol=1e-5), (d_kernel, d_ref)
    else:
        ref_weights = w_np[np.unique(ref_closest)]
        assert final_weights.shape == ref_weights.shape
        assert np.allclose(final_weights, ref_weights)

    # Internal consistency of the returned unique-BMU weights.
    assert np.array_equal(final_weights, w_np[np.unique(closest)])

    print("KERNEL_OK")
</pallas_src>

<mosaic_0001>
module attributes {stable_mosaic.version = 11 : i64} {
  func.func @_som_bmu_kernel(%arg0: i32, %arg1: memref<16x32xf32, #tpu.memory_space<vmem>>, %arg2: memref<16x1xf32, #tpu.memory_space<vmem>>, %arg3: memref<128x32xf32, #tpu.memory_space<vmem>>, %arg4: memref<1x128xi32, #tpu.memory_space<vmem>>) attributes {dimension_semantics = [#tpu.dimension_semantics<parallel>], iteration_bounds = array<i64: 1>, scalar_prefetch = 0 : i64, scratch_operands = 0 : i64, tpu.core_type = #tpu.core_type<tc>, window_params = [{pipeline_mode = #tpu.pipeline_mode<synchronous>, transform_indices = @transform_0, window_bounds = array<i64: 16, 32>}, {pipeline_mode = #tpu.pipeline_mode<synchronous>, transform_indices = @transform_1, window_bounds = array<i64: 16, 1>}, {transform_indices = @transform_2, window_bounds = array<i64: 128, 32>}, {transform_indices = @transform_3, window_bounds = array<i64: 1, 128>}]} {
    %c0 = arith.constant 0 : index
    %c0_0 = arith.constant 0 : index
    %0 = vector.load %arg1[%c0, %c0_0] : memref<16x32xf32, #tpu.memory_space<vmem>>, vector<16x32xf32>
    %c0_1 = arith.constant 0 : index
    %c0_2 = arith.constant 0 : index
    %1 = vector.load %arg3[%c0_1, %c0_2] : memref<128x32xf32, #tpu.memory_space<vmem>>, vector<128x32xf32>
    %cst = arith.constant dense<0.000000e+00> : vector<16x128xf32>
    %2 = tpu.matmul %0, %1, %cst {dimension_numbers = #tpu.dot_dimension_numbers<[1], [1], [0], [0], [0, 0, 1, 0], [], []>} : vector<16x32xf32>, vector<128x32xf32>, vector<16x128xf32> -> vector<16x128xf32>
    %c0_3 = arith.constant 0 : index
    %c0_4 = arith.constant 0 : index
    %3 = vector.load %arg2[%c0_3, %c0_4] : memref<16x1xf32, #tpu.memory_space<vmem>>, vector<16x1xf32>
    %4 = vector.broadcast %3 : vector<16x1xf32> to vector<16x128xf32>
    %5 = arith.subf %4, %2 : vector<16x128xf32>
    %6 = tpu.reduce_index %5 {axis = 0 : i32, kind = #tpu.reduction_kind<arg_min>} : vector<16x128xf32> -> vector<128xi32>
    %7 = vector.shape_cast %6 : vector<128xi32> to vector<1x128xi32>
    %c0_5 = arith.constant 0 : index
    %c0_6 = arith.constant 0 : index
    %8 = vector.load %arg4[%c0_5, %c0_6] : memref<1x128xi32, #tpu.memory_space<vmem>>, vector<1x128xi32>
    tpu.vector_store %arg4[%c0_5, %c0_6], %7 {strides = array<i32>} : memref<1x128xi32, #tpu.memory_space<vmem>>, vector<1x128xi32>,
    return
  }
  func.func @transform_0(%arg0: i32) -> (i32, i32) {
    %c0_i32 = arith.constant 0 : i32
    %c0_i32_0 = arith.constant 0 : i32
    %c0_i32_1 = arith.constant 0 : i32
    return %c0_i32, %c0_i32_0 : i32, i32
  }
  func.func @transform_1(%arg0: i32) -> (i32, i32) {
    %c0_i32 = arith.constant 0 : i32
    %c0_i32_0 = arith.constant 0 : i32
    %c0_i32_1 = arith.constant 0 : i32
    return %c0_i32, %c0_i32_0 : i32, i32
  }
  func.func @transform_2(%arg0: i32) -> (i32, i32) {
    %c0_i32 = arith.constant 0 : i32
    %c0_i32_0 = arith.constant 0 : i32
    return %arg0, %c0_i32 : i32, i32
  }
  func.func @transform_3(%arg0: i32) -> (i32, i32) {
    %c0_i32 = arith.constant 0 : i32
    %c0_i32_0 = arith.constant 0 : i32
    return %c0_i32, %arg0 : i32, i32
  }
}

</mosaic_0001>

<bundles_post_ra>
// kernel: _som_bmu_indices_impl.1
= control target key start
LH: loop header
LB: loop body
LE: loop exit
PB: predicated region body
PF: predicated region fallthrough
CT: control target
= control target key end

     0   :  { %vm32_vm0 = vcmask 261120   ;;  %v185_v9 = vmov 0   ;;  %v124_v22 = vlaneseq  ;;  %s303_s2 = inlined_call_operand.vmem [shape: f32[128,32], index: 2, kind: input, shape index: {}]   ;;  %s304_s1 = inlined_call_operand.vmem [shape: f32[16,1], index: 1, kind: input, shape index: {}]   ;;  %s305_s0 = inlined_call_operand.vmem [shape: f32[16,32], index: 0, kind: input, shape index: {}]   ;;  %s306_s3 = inlined_call_operand.vmem [shape: s32[1,128], index: 3, kind: output, shape index: {}]  }
   0x1   :  { %v31_v0 = vld [vmem:[%s303_s2 + $0x78] sm:$0xff]  ;;  %v30_v1 = vld [vmem:[%s303_s2 + $0x70] sm:$0xff]  ;;  %v29_v2 = vld [vmem:[%s303_s2 + $0x68] sm:$0xff]  ;;  %184 = vset.pattern.permute.xlu0 %v185_v9 }
   0x2   :  { %149 = vmatpush.xpose.msk.msra.mxu0 %vm32_vm0, %v31_v0  ;;  %167 = vmatpush.xpose.msk.msra.mxu1 %vm32_vm0, %v31_v0  ;;  %v28_v3 = vld [vmem:[%s303_s2 + $0x60] sm:$0xff]  ;;  %v27_v4 = vld [vmem:[%s303_s2 + $0x58] sm:$0xff]  ;;  %v26_v5 = vld [vmem:[%s303_s2 + $0x50] sm:$0xff]  ;;  %v125_v23 = vshrl.u32 %v124_v22, 7 }
   0x3   :  { %v25_v6 = vld [vmem:[%s303_s2 + $0x48] sm:$0xff]  ;;  %v110_v7 = vld [vmem:[%s304_s1] sm:$0xff]  ;;  %v23_v10 = vld [vmem:[%s303_s2 + $0x38] sm:$0xff] }
   0x4   :  { %v24_v8 = vld [vmem:[%s303_s2 + $0x40] sm:$0xff]  ;;  %114 = vperm.xlu0 %184, %v110_v7   ;;  %v111_v11 = vld [vmem:[%s304_s1 + $0x8] sm:$0xff]  ;;  %v22_v12 = vld [vmem:[%s303_s2 + $0x30] sm:$0xff]  ;;  %v126_v27 = vadd.s32 8, %v125_v23 }
   0x5   :  { %v21_v13 = vld [vmem:[%s303_s2 + $0x28] sm:$0xff]  ;;  %v20_v14 = vld [vmem:[%s303_s2 + $0x20] sm:$0xff]  ;;  %v19_v15 = vld [vmem:[%s303_s2 + $0x18] sm:$0xff] }
   0x6   :  { %150 = vmatpush.xpose.msk.msra.mxu0 %vm32_vm0, %v30_v1  ;;  %168 = vmatpush.xpose.msk.msra.mxu1 %vm32_vm0, %v30_v1  ;;  %v18_v16 = vld [vmem:[%s303_s2 + $0x10] sm:$0xff]  ;;  %v17_v17 = vld [vmem:[%s303_s2 + $0x8] sm:$0xff]  ;;  %v16_v18 = vld [vmem:[%s303_s2] sm:$0xff] }
   0x7   :  { %v14_v19 = vld [vmem:[%s305_s0] sm:$0xff]  ;;  %v15_v20 = vld [vmem:[%s305_s0 + $0x8] sm:$0xff] }
   0xa   :  { %151 = vmatpush.xpose.msk.msra.mxu0 %vm32_vm0, %v29_v2  ;;  %169 = vmatpush.xpose.msk.msra.mxu1 %vm32_vm0, %v29_v2 }
   0xc   :  { %119 = vperm.xlu0 %184, %v111_v11  }
   0xe   :  { %152 = vmatpush.xpose.msk.msra.mxu0 %vm32_vm0, %v28_v3  ;;  %170 = vmatpush.xpose.msk.msra.mxu1 %vm32_vm0, %v28_v3 }
  0x12   :  { %153 = vmatpush.xpose.msk.msra.mxu0 %vm32_vm0, %v27_v4  ;;  %171 = vmatpush.xpose.msk.msra.mxu1 %vm32_vm0, %v27_v4 }
  0x16   :  { %154 = vmatpush.xpose.msk.msra.mxu0 %vm32_vm0, %v26_v5  ;;  %172 = vmatpush.xpose.msk.msra.mxu1 %vm32_vm0, %v26_v5 }
  0x1a   :  { %155 = vmatpush.xpose.msk.msra.mxu0 %vm32_vm0, %v25_v6  ;;  %173 = vmatpush.xpose.msk.msra.mxu1 %vm32_vm0, %v25_v6 }
  0x1e   :  { %156 = vmatpush.xpose.msk.msra.mxu0 %vm32_vm0, %v24_v8  ;;  %174 = vmatpush.xpose.msk.msra.mxu1 %vm32_vm0, %v24_v8 }
  0x22   :  { %157 = vmatpush.xpose.msk.msra.mxu0 %vm32_vm0, %v23_v10  ;;  %175 = vmatpush.xpose.msk.msra.mxu1 %vm32_vm0, %v23_v10 }
  0x26   :  { %158 = vmatpush.xpose.msk.msra.mxu0 %vm32_vm0, %v22_v12  ;;  %176 = vmatpush.xpose.msk.msra.mxu1 %vm32_vm0, %v22_v12 }
  0x2a   :  { %159 = vmatpush.xpose.msk.msra.mxu0 %vm32_vm0, %v21_v13  ;;  %177 = vmatpush.xpose.msk.msra.mxu1 %vm32_vm0, %v21_v13 }
  0x2e   :  { %160 = vmatpush.xpose.msk.msra.mxu0 %vm32_vm0, %v20_v14  ;;  %178 = vmatpush.xpose.msk.msra.mxu1 %vm32_vm0, %v20_v14 }
  0x32   :  { %161 = vmatpush.xpose.msk.msra.mxu0 %vm32_vm0, %v19_v15  ;;  %179 = vmatpush.xpose.msk.msra.mxu1 %vm32_vm0, %v19_v15 }
  0x36   :  { %162 = vmatpush.xpose.msk.msra.mxu0 %vm32_vm0, %v18_v16  ;;  %180 = vmatpush.xpose.msk.msra.mxu1 %vm32_vm0, %v18_v16 }
  0x3a   :  { %163 = vmatpush.xpose.msk.msra.mxu0 %vm32_vm0, %v17_v17  ;;  %181 = vmatpush.xpose.msk.msra.mxu1 %vm32_vm0, %v17_v17 }
  0x3e   :  { %164 = vmatpush.xpose.msk.msra.mxu0 %vm32_vm0, %v16_v18  ;;  %182 = vmatpush.xpose.msk.msra.mxu1 %vm32_vm0, %v16_v18 }
  0x41   :  { %165 = vmatmul.msk.f32.vlgmr.msra.gmra.mxu0 %vm32_vm0, %v14_v19  ;;  %166 = vmatmul.msk.f32.vlgmr.msra.gmra.mxu1 %vm32_vm0, %v15_v20 }
  0x76   :  { %v115_v21 = vpop.permute.xlu0 %114 }
  0x7e   :  { %v120_v24 = vpop.permute.xlu0 %119 }
  0xbe   :  { %v104_v25 = vpop.f32.mrf.mxu0  ;;  %v107_v26 = vpop.f32.mrf.mxu1 }
  0xbf   :  { %v122_v28 = vsub.f32 %v115_v21, %v104_v25  ;;  %v123_v29 = vsub.f32 %v120_v24, %v107_v26 }
  0xc1   :  { %vm127_vm1 = vcmp.le.f32.partialorder %v122_v28, %v123_v29 }
  0xc2   :  { %v128_v30 = vsel %vm127_vm1, %v122_v28, %v123_v29  ;;  %v129_v31 = vsel %vm127_vm1, %v125_v23, %v126_v27 }
  0xc3   :  { %v130_v32 = vrot.slane %v128_v30, 4  ;;  %v131_v33 = vrot.slane %v129_v31, 4 }
  0xc5   :  { %vm132_vm2 = vcmp.le.f32.partialorder %v128_v30, %v130_v32 }
  0xc6   :  { %v133_v34 = vsel %vm132_vm2, %v128_v30, %v130_v32  ;;  %v134_v35 = vsel %vm132_vm2, %v129_v31, %v131_v33 }
  0xc7   :  { %v135_v36 = vrot.slane %v133_v34, 6  ;;  %v136_v37 = vrot.slane %v134_v35, 6 }
  0xc9   :  { %vm137_vm3 = vcmp.le.f32.partialorder %v133_v34, %v135_v36 }
  0xca   :  { %v138_v38 = vsel %vm137_vm3, %v133_v34, %v135_v36  ;;  %v139_v39 = vsel %vm137_vm3, %v134_v35, %v136_v37 }
  0xcb   :  { %v140_v40 = vrot.slane %v138_v38, 7  ;;  %v141_v41 = vrot.slane %v139_v39, 7 }
  0xcd   :  { %vm142_vm4 = vcmp.le.f32.partialorder %v138_v38, %v140_v40 }
  0xce   :  { %v143_v42 = vsel %vm142_vm4, %v139_v39, %v141_v41 }
  0xcf   :  { %144 = vst [vmem:[%s306_s3] sm:$0x1] %v143_v42 }

</bundles_post_ra>
